<compile_context>
chip_gen: v7x
topology: tpu7x:2x2x1
jax: 0.10.0
libtpu: 0.0.40
codegen_flags: <defaults>
</compile_context>

<pallas_src>
import functools
import math

import jax
import jax.numpy as jnp
from jax.experimental import pallas as pl
from jax.experimental.pallas import tpu as pltpu


def _positional_encoding_table(S, E):
    """Sinusoidal PE table (S, E) float32, matching the PyTorch module."""
    d = jnp.arange(E)
    exponent = (2 * (d // 2)).astype(jnp.float32) / jnp.float32(E)
    angles = 1.0 / (10000.0 ** exponent)                 # (E,)
    pos = jnp.arange(S, dtype=jnp.float32)[:, None]      # (S, 1)
    ang = pos * angles[None, :]                          # (S, E)
    return jnp.where((d % 2 == 0)[None, :], jnp.sin(ang), jnp.cos(ang)).astype(
        jnp.float32
    )


def _add_pe_kernel(x_ref, pe_ref, o_ref, *, p, training, seed, s2, e2,
                   b_tile, tile_s):
    # x_ref / o_ref: (b_tile, tile_s, E2); pe_ref: (tile_s, E2), broadcast over batch.
    y = x_ref[...].astype(jnp.float32) + pe_ref[...][None].astype(jnp.float32)

    if training and p > 0.0:
        # Stateless, hash-based inverted dropout (lowbias32 finalizer).  Pure
        # uint32 VPU ops -> no stateful PRNG primitive, works on TPU and in
        # interpret mode.  Mask is a function of (global element index, seed).
        si = pl.program_id(0)
        bi = pl.program_id(1)
        b_idx = (jax.lax.broadcasted_iota(jnp.int32, y.shape, 0)
                 + bi * b_tile).astype(jnp.uint32)
        r_idx = (jax.lax.broadcasted_iota(jnp.int32, y.shape, 1)
                 + si * tile_s).astype(jnp.uint32)
        c_idx = jax.lax.broadcasted_iota(jnp.uint32, y.shape, 2)
        lin = (b_idx * jnp.uint32(s2) + r_idx) * jnp.uint32(e2) + c_idx
        h = lin + jnp.uint32(seed & 0xFFFFFFFF) * jnp.uint32(0x9E3779B1)
        h = (h ^ (h >> 16)) * jnp.uint32(0x7FEB352D)
        h = (h ^ (h >> 15)) * jnp.uint32(0x846CA68B)
        h = h ^ (h >> 16)
        threshold = jnp.uint32(min(int(round(p * 4294967296.0)), 0xFFFFFFFF))
        scale = jnp.float32(1.0 / (1.0 - p))              # precomputed, no divide
        y = jnp.where(h >= threshold, y * scale, jnp.float32(0.0))

    o_ref[...] = y.astype(o_ref.dtype)


@functools.partial(jax.jit, static_argnames=("p", "training", "seed"))
def _positional_encoder_impl(x, *, p, training, seed):
    B, S, E = x.shape
    if training:
        assert 0.0 <= p < 1.0, "dropout p must be in [0, 1)"

    # Lane-density fold: fold f sequence rows into the lane dim so the last dim
    # (E2 = lcm(E, 128)) is a multiple of 128 -> unmasked full-width stores.
    # If S isn't divisible by f, zero-pad S (padded rows are sliced off later).
    f = 128 // math.gcd(E, 128)
    S_pad = (-(-S // f)) * f if f > 1 else S

    # PE computed once (constant-folded under jit); cast to x.dtype to halve PE
    # HBM traffic for low-precision inputs; the add itself stays in f32.
    pe = _positional_encoding_table(S_pad, E).astype(x.dtype)

    xp = x if S_pad == S else jnp.pad(x, ((0, 0), (0, S_pad - S), (0, 0)))
    S2, E2 = S_pad // f, E * f
    x2 = xp.reshape(B, S2, E2)
    pe2 = pe.reshape(S2, E2)

    itemsize = jnp.dtype(x.dtype).itemsize
    # ~4 MiB of x per grid step: amortizes the ~0.35us per-step overhead to the
    # 85-90% HBM-roofline plateau on v5e/v6e/v7x; double-buffered x/pe/out plus
    # f32 temporaries stay well inside v7x's 64 MiB VMEM (48 MiB scoped limit).
    target_bytes = 4 * 1024 * 1024
    row_bytes = E2 * itemsize
    slab_bytes = max(S2 * row_bytes, 1)          # one batch element
    if slab_bytes <= target_bytes:
        tile_s = S2
        b_tile = max(1, min(B, target_bytes // slab_bytes))
        while B % b_tile:                        # must divide B
            b_tile -= 1
    else:
        b_tile = 1
        tile_s = min(S2, max(8, (target_bytes // row_bytes) // 8 * 8))

    num_s = -(-S2 // tile_s)
    # Keep >=2 total grid steps when possible so both v7x TensorCores get work.
    if num_s * (B // b_tile) < 2 and b_tile > 1:
        b_tile = max(1, b_tile // 2)
        while B % b_tile:
            b_tile -= 1
    grid = (num_s, B // b_tile)                  # S-tiles outer, batch-tiles inner

    kernel = functools.partial(
        _add_pe_kernel, p=p, training=training, seed=seed,
        s2=S2, e2=E2, b_tile=b_tile, tile_s=tile_s)

    out2 = pl.pallas_call(
        kernel,
        out_shape=jax.ShapeDtypeStruct((B, S2, E2), x.dtype),
        grid=grid,
        in_specs=[
            # x: batch-tile x row-tile slab (~target_bytes per grid step).
            pl.BlockSpec((b_tile, tile_s, E2), lambda s, b: (b, s, 0)),
            # PE: block index independent of the inner (batch) axis -> its DMA
            # is elided across all batch-tile steps of a given S-tile.
            pl.BlockSpec((tile_s, E2), lambda s, b: (s, 0)),
        ],
        out_specs=pl.BlockSpec((b_tile, tile_s, E2), lambda s, b: (b, s, 0)),
        compiler_params=pltpu.CompilerParams(
            dimension_semantics=("parallel", "parallel"),
            vmem_limit_bytes=48 * 1024 * 1024,
        ),
    )(x2, pe2)

    out = out2.reshape(B, S_pad, E)
    return out if S_pad == S else out[:, :S, :]


def positional_encoder(x, *, p=0.1, training=False, seed=0):
    """x: (B, S, E). Returns x + sinusoidal PE, with inverted dropout if training."""
    return _positional_encoder_impl(
        x, p=float(p), training=bool(training), seed=int(seed))


def _reference(x):
    """Pure-JAX reference matching the PyTorch forward (eval mode)."""
    B, S, E = x.shape
    pe = _positional_encoding_table(S, E)
    return (x.astype(jnp.float32) + pe[None]).astype(x.dtype)


if __name__ == "__main__":
    key = jax.random.PRNGKey(0)
    B, S, E = 2, 8, 32                        # batch, max_cell, emb_dim
    x = jax.random.normal(key, (B, S, E), dtype=jnp.float32)

    # Eval mode: dropout is identity -> must match the analytic reference.
    out = jax.block_until_ready(positional_encoder(x, training=False))
    ref = _reference(x)
    assert out.shape == x.shape and out.dtype == x.dtype
    assert jnp.allclose(out, ref, atol=1e-5, rtol=1e-5), "mismatch vs reference"

    # S not divisible by the lane-fold factor -> exercises the padding path.
    x9 = jax.random.normal(jax.random.PRNGKey(1), (B, 9, E), dtype=jnp.float32)
    out9 = jax.block_until_ready(positional_encoder(x9, training=False))
    assert jnp.allclose(out9, _reference(x9), atol=1e-5, rtol=1e-5), "padded mismatch"

    # Training mode: every element is either dropped (0) or (x+pe)/(1-p).
    p = 0.1
    out_tr = jax.block_until_ready(
        positional_encoder(x, p=p, training=True, seed=123))
    scaled = ref.astype(jnp.float32) / (1.0 - p)
    ok = jnp.isclose(out_tr, 0.0, atol=1e-6) | jnp.isclose(
        out_tr, scaled, atol=1e-4, rtol=1e-4)
    assert out_tr.shape == x.shape and out_tr.dtype == x.dtype
    assert bool(jnp.all(ok)), "dropout values not in {0, (x+pe)/(1-p)}"

    print("KERNEL_OK")
</pallas_src>

<mosaic_0001>
module attributes {stable_mosaic.version = 11 : i64} {
  func.func @_add_pe_kernel(%arg0: i32, %arg1: i32, %arg2: memref<1x2x128xf32, #tpu.memory_space<vmem>>, %arg3: memref<2x128xf32, #tpu.memory_space<vmem>>, %arg4: memref<1x2x128xf32, #tpu.memory_space<vmem>>) attributes {dimension_semantics = [#tpu.dimension_semantics<parallel>, #tpu.dimension_semantics<parallel>], iteration_bounds = array<i64: 1, 2>, scalar_prefetch = 0 : i64, scratch_operands = 0 : i64, tpu.core_type = #tpu.core_type<tc>, window_params = [{transform_indices = @transform_0, window_bounds = array<i64: 1, 2, 128>}, {transform_indices = @transform_1, window_bounds = array<i64: 2, 128>}, {transform_indices = @transform_2, window_bounds = array<i64: 1, 2, 128>}]} {
    %c0 = arith.constant 0 : index
    %c0_0 = arith.constant 0 : index
    %c0_1 = arith.constant 0 : index
    %0 = vector.load %arg2[%c0, %c0_0, %c0_1] : memref<1x2x128xf32, #tpu.memory_space<vmem>>, vector<1x2x128xf32>
    %c0_2 = arith.constant 0 : index
    %c0_3 = arith.constant 0 : index
    %1 = vector.load %arg3[%c0_2, %c0_3] : memref<2x128xf32, #tpu.memory_space<vmem>>, vector<2x128xf32>
    %2 = vector.shape_cast %1 : vector<2x128xf32> to vector<1x2x128xf32>
    %3 = arith.addf %0, %2 : vector<1x2x128xf32>
    %c0_4 = arith.constant 0 : index
    %c0_5 = arith.constant 0 : index
    %c0_6 = arith.constant 0 : index
    %4 = vector.load %arg4[%c0_4, %c0_5, %c0_6] : memref<1x2x128xf32, #tpu.memory_space<vmem>>, vector<1x2x128xf32>
    tpu.vector_store %arg4[%c0_4, %c0_5, %c0_6], %3 {strides = array<i32>} : memref<1x2x128xf32, #tpu.memory_space<vmem>>, vector<1x2x128xf32>,
    return
  }
  func.func @transform_0(%arg0: i32, %arg1: i32) -> (i32, i32, i32) {
    %c0_i32 = arith.constant 0 : i32
    %c0_i32_0 = arith.constant 0 : i32
    return %arg1, %arg0, %c0_i32 : i32, i32, i32
  }
  func.func @transform_1(%arg0: i32, %arg1: i32) -> (i32, i32) {
    %c0_i32 = arith.constant 0 : i32
    %c0_i32_0 = arith.constant 0 : i32
    return %arg0, %c0_i32 : i32, i32
  }
  func.func @transform_2(%arg0: i32, %arg1: i32) -> (i32, i32, i32) {
    %c0_i32 = arith.constant 0 : i32
    %c0_i32_0 = arith.constant 0 : i32
    return %arg1, %arg0, %c0_i32 : i32, i32, i32
  }
}

</mosaic_0001>

<bundles_post_ra>
// kernel: _positional_encoder_impl.1
= control target key start
LH: loop header
LB: loop body
LE: loop exit
PB: predicated region body
PF: predicated region fallthrough
CT: control target
= control target key end

     0   :  { %s354_s9 = smov 0   ;;  %s331_s10 = smov 0   ;;  %s368_s0 = inlined_call_operand.vmem [shape: f32[2,2,128], index: 0, kind: input, shape index: {}]   ;;  %s369_s1 = inlined_call_operand.vmem [shape: f32[2,128], index: 1, kind: input, shape index: {}]   ;;  %s370_s2 = inlined_call_operand.vmem [shape: f32[2,2,128], index: 2, kind: output, shape index: {}]  }
   0x1   :  { %s335_s11 = smov 0  }
   0x2 LB: > { %s21_s12 = sadd.s32 1, %s333_s10  ;;  %p286_p0 = scmp.ge.s32.totalorder %s337_s11, 1  ;;  %s337_s11 = sphi %s335_s11, %s12_s11   ;;  %s333_s10 = sphi %s331_s10, %s332_s10   ;;  %s329_s9 = sphi %s354_s9, %s371_s9  }
   0x3   : > { %p22_p1 = scmp.ge.s32.totalorder %s21_s12, 2  ;;  %p139_p2 = scmp.lt.s32.totalorder %s337_s11, 3 }
   0x5   : > { %s373_s12 = smov (%p22_p1, %s21_s12), 0  ;;  %p140_p3 = pnand %p286_p0, %p139_p2 }
   0x6   : > { %p169_p4 = scmp.lt.s32.totalorder (!%p140_p3), %s329_s9, 1  ;;  %v188_v0 = vld [vmem:[%s369_s1] sm:$0x3] (!%p140_p3) }
   0x7   : > { %143 = sbr.rel (%p140_p3) target bundleno = 21 (0x15), region = 28 }
   0xe   : > { %s375_s9 = smov (!%p169_p4, %s329_s9), 1 }
   0xf   : > { %s287_s13 = sshll.u32 %s375_s9, 1 }
  0x10   : > { %s175_s18 = scalar_lea.vmem %s368_s0, %s287_s13  ;;  %s186_s21 = scalar_lea.vmem %s370_s2, %s287_s13 }
  0x11   : > { %v187_v1 = vld [vmem:[%s175_s18] sm:$0x3] }
  0x12   : > { %v189_v2 = vadd.f32 %v188_v0, %v187_v1 }
  0x14   : > { %190 = vst [vmem:[%s186_s21] sm:$0x3] %v189_v2 }
  0x15 PF: > { %s12_s11 = sadd.s32 1, %s337_s11   ;;  %s371_s9 = smov %s333_s10 }
  0x16   : > { %p9_p5 = scmp.ge.s32.totalorder %s12_s11, 4   ;;  %s332_s10 = smov %s373_s12  }
  0x18   :  { %11 = sbr.rel (!%p9_p5) target bundleno = 2 (0x2), region = 61 }

</bundles_post_ra>
